<compile_context>
chip_gen: v5e
topology: v5e:2x2
jax: 0.10.0
libtpu: 0.0.40
codegen_flags: <defaults>
</compile_context>

<pallas_src>
import functools

import jax
import jax.numpy as jnp
from jax.experimental import pallas as pl
from jax.experimental.pallas import tpu as pltpu


def _ul2ptq3_kernel(x_ref, b_ref, o_ref, *, act):
    # x_ref: (tr, tl) activation tile; b_ref: (tr, 1) f32 per-row (per-channel) bias.
    out = x_ref[...].astype(jnp.float32) + b_ref[...]   # broadcast over lanes
    if act == "relu":
        out = jnp.maximum(out, 0.0)
    elif act == "gelu":
        # torch.nn.GELU default is exact erf, not the tanh approximation.
        out = jax.nn.gelu(out, approximate=False)
    # act is None -> identity (matches act_func=None default)
    o_ref[...] = out.astype(o_ref.dtype)


def _round_up(x, m):
    return (x + m - 1) // m * m


def _choose_tiles(R, HW, itemsize, target_block_bytes):
    """Pick (tr, tl) row/lane tile sizes.

    Prefers full-HW lane blocks (one contiguous HBM run per row group); keeps the
    row grid >= 2 (ideally >= 4) steps so v7x's two TensorCores both get work.
    """
    row_bytes = max(HW * itemsize, 1)
    if 8 * row_bytes <= target_block_bytes:
        # Full-width lanes.
        tl = HW
        tr = max(8, (target_block_bytes // row_bytes) // 8 * 8)
        if R >= 32:
            tr = min(tr, max(8, _round_up(pl.cdiv(R, 4), 8)))   # >= ~4 row steps
        elif R > 8:
            tr = min(tr, max(8, _round_up(pl.cdiv(R, 2), 8)))   # >= 2 row steps
        if R < 8:
            tr = R                                   # block == full (short) row dim
        else:
            tr = max(8, min(tr, (R // 8) * 8))       # multiple of 8, <= R
    else:
        # A single 8-row group already exceeds the budget: tile the lane axis too.
        tr = 8 if R >= 8 else R
        tl = max(128, (target_block_bytes // (8 * itemsize)) // 128 * 128)
        tl = min(tl, (HW // 128) * 128) if HW >= 128 else HW
    return tr, tl


def ul2ptq3_forward(x, bias, act=None, *, target_block_bytes=2 << 20):
    """UL2PTQ3.forward for a conv-style NCHW activation, channel_axis=(1,)."""
    N, C, H, W = x.shape
    assert bias.shape == (C,), f"bias {bias.shape} incompatible with channel_size {C}"
    HW = H * W
    R = N * C
    itemsize = jnp.dtype(x.dtype).itemsize

    # Zero-copy 2D view (reshape of a contiguous NCHW tensor is free).
    x2 = x.reshape(R, HW)

    # Per-row bias, kept in f32 (promote-then-add; single downcast in the kernel).
    # Row r = n*C + c  ->  bias[c], i.e. tile over the batch dimension.
    b2 = jnp.tile(bias.astype(jnp.float32), N).reshape(R, 1)

    tr, tl = _choose_tiles(R, HW, itemsize, target_block_bytes)
    # Lane (j) axis innermost so the (i, 0) bias block index repeats across
    # consecutive steps and its DMA is elided.
    grid = (pl.cdiv(R, tr), pl.cdiv(HW, tl))

    # VMEM budget: in + out double buffers (+ tiny f32 bias column), with margin.
    blk_bytes = _round_up(tr, 8) * _round_up(tl, 128) * itemsize
    bias_bytes = _round_up(tr, 8) * 128 * 4
    vmem_needed = 4 * blk_bytes + 2 * bias_bytes
    vmem_limit = int(min(max(2 * vmem_needed, 16 << 20), 32 << 20))

    flops = 2 * R * HW
    cost = pl.CostEstimate(
        flops=flops,
        transcendentals=(R * HW) if act == "gelu" else 0,
        bytes_accessed=2 * R * HW * itemsize + R * 4,
    )

    kernel = functools.partial(_ul2ptq3_kernel, act=act)

    out2 = pl.pallas_call(
        kernel,
        out_shape=jax.ShapeDtypeStruct((R, HW), x.dtype),
        grid_spec=pltpu.PrefetchScalarGridSpec(
            num_scalar_prefetch=0,
            grid=grid,
            in_specs=[
                pl.BlockSpec((tr, tl), lambda i, j: (i, j)),   # activation tile
                pl.BlockSpec((tr, 1), lambda i, j: (i, 0)),    # per-row bias column
            ],
            out_specs=pl.BlockSpec((tr, tl), lambda i, j: (i, j)),
        ),
        compiler_params=pltpu.CompilerParams(
            dimension_semantics=("parallel", "parallel"),
            vmem_limit_bytes=vmem_limit,
        ),
        cost_estimate=cost,
    )(x2, b2)

    return out2.reshape(N, C, H, W)


def ul2ptq3_reference(x, bias, act=None):
    out = x.astype(jnp.float32) + bias.reshape(1, -1, 1, 1).astype(jnp.float32)
    if act == "relu":
        out = jnp.maximum(out, 0.0)
    elif act == "gelu":
        out = jax.nn.gelu(out, approximate=False)
    return out.astype(x.dtype)


if __name__ == "__main__":
    key = jax.random.PRNGKey(0)
    kx, kb = jax.random.split(key)

    # ---- default UL2PTQ3 config: conv NCHW output, channel_axis=(1,), act_func=None
    N, C, H, W = 2, 4, 16, 16
    x = jax.random.normal(kx, (N, C, H, W), dtype=jnp.float32)
    # nn.Parameter is zeros at __init__; use a deterministic nonzero bias so the
    # broadcast path is actually exercised (synthetic init, no checkpoint).
    bias = jax.random.normal(kb, (C,), dtype=jnp.float32)

    y = jax.block_until_ready(ul2ptq3_forward(x, bias, act=None))
    y_ref = ul2ptq3_reference(x, bias, act=None)
    assert y.shape == x.shape and y.dtype == x.dtype
    assert jnp.allclose(y, y_ref, atol=1e-6, rtol=1e-6), "mismatch vs reference (act=None)"

    # ---- act_func paths
    y2 = jax.block_until_ready(ul2ptq3_forward(x, bias, act="relu"))
    assert jnp.allclose(y2, ul2ptq3_reference(x, bias, act="relu"), atol=1e-6, rtol=1e-6)

    y3 = jax.block_until_ready(ul2ptq3_forward(x, bias, act="gelu"))
    assert jnp.allclose(y3, ul2ptq3_reference(x, bias, act="gelu"), atol=1e-5, rtol=1e-5)

    # ---- non-128-aligned spatial / row count < 8: masked-tail (no host pad) path
    N2, C2, H2, W2 = 1, 3, 14, 14
    x_odd = jax.random.normal(kx, (N2, C2, H2, W2), dtype=jnp.float32)
    b_odd = jax.random.normal(kb, (C2,), dtype=jnp.float32)
    y4 = jax.block_until_ready(ul2ptq3_forward(x_odd, b_odd, act="relu"))
    assert jnp.allclose(y4, ul2ptq3_reference(x_odd, b_odd, act="relu"), atol=1e-6, rtol=1e-6)

    # ---- multi-row-tile grid (exercises tr cap + full-HW lane blocks)
    N3, C3, H3, W3 = 2, 64, 28, 28
    x_big = jax.random.normal(kx, (N3, C3, H3, W3), dtype=jnp.float32)
    b_big = jax.random.normal(kb, (C3,), dtype=jnp.float32)
    y5 = jax.block_until_ready(ul2ptq3_forward(x_big, b_big, act=None))
    assert jnp.allclose(y5, ul2ptq3_reference(x_big, b_big, act=None), atol=1e-6, rtol=1e-6)

    # ---- low-precision activation: promote-then-add, single downcast at the store
    x_bf = x.astype(jnp.bfloat16)
    y6 = jax.block_until_ready(ul2ptq3_forward(x_bf, bias, act="relu"))
    assert jnp.allclose(y6.astype(jnp.float32),
                        ul2ptq3_reference(x_bf, bias, act="relu").astype(jnp.float32),
                        atol=2e-2, rtol=2e-2)

    print("KERNEL_OK")
</pallas_src>

<mosaic_0001>
module attributes {stable_mosaic.version = 11 : i64} {
  func.func @_ul2ptq3_kernel(%arg0: i32, %arg1: i32, %arg2: memref<8x256xf32, #tpu.memory_space<vmem>>, %arg3: memref<8x1xf32, #tpu.memory_space<vmem>>, %arg4: memref<8x256xf32, #tpu.memory_space<vmem>>) attributes {dimension_semantics = [#tpu.dimension_semantics<parallel>, #tpu.dimension_semantics<parallel>], iteration_bounds = array<i64: 1, 1>, scalar_prefetch = 0 : i64, scratch_operands = 0 : i64, tpu.core_type = #tpu.core_type<tc>, window_params = [{transform_indices = @transform_0, window_bounds = array<i64: 8, 256>}, {transform_indices = @transform_1, window_bounds = array<i64: 8, 1>}, {transform_indices = @transform_2, window_bounds = array<i64: 8, 256>}]} {
    %c0 = arith.constant 0 : index
    %c0_0 = arith.constant 0 : index
    %0 = vector.load %arg2[%c0, %c0_0] : memref<8x256xf32, #tpu.memory_space<vmem>>, vector<8x256xf32>
    %c0_1 = arith.constant 0 : index
    %c0_2 = arith.constant 0 : index
    %1 = vector.load %arg3[%c0_1, %c0_2] : memref<8x1xf32, #tpu.memory_space<vmem>>, vector<8x1xf32>
    %2 = vector.broadcast %1 : vector<8x1xf32> to vector<8x256xf32>
    %3 = arith.addf %0, %2 : vector<8x256xf32>
    %c0_3 = arith.constant 0 : index
    %c0_4 = arith.constant 0 : index
    %4 = vector.load %arg4[%c0_3, %c0_4] : memref<8x256xf32, #tpu.memory_space<vmem>>, vector<8x256xf32>
    tpu.vector_store %arg4[%c0_3, %c0_4], %3 {strides = array<i32>} : memref<8x256xf32, #tpu.memory_space<vmem>>, vector<8x256xf32>,
    return
  }
  func.func @transform_0(%arg0: i32, %arg1: i32) -> (i32, i32) {
    %c0_i32 = arith.constant 0 : i32
    return %arg0, %arg1 : i32, i32
  }
  func.func @transform_1(%arg0: i32, %arg1: i32) -> (i32, i32) {
    %c0_i32 = arith.constant 0 : i32
    %c0_i32_0 = arith.constant 0 : i32
    return %arg0, %c0_i32 : i32, i32
  }
  func.func @transform_2(%arg0: i32, %arg1: i32) -> (i32, i32) {
    %c0_i32 = arith.constant 0 : i32
    return %arg0, %arg1 : i32, i32
  }
}

</mosaic_0001>

<bundles_post_ra>
// kernel: tpu_custom_call.1
= control target key start
LH: loop header
LB: loop body
LE: loop exit
PB: predicated region body
PF: predicated region fallthrough
CT: control target
= control target key end

     0   :  { %7 = vsyncpa [#allocation3], 0  ;;  %s138_s0 = inlined_call_operand.hbm [shape: f32[8,256], index: 0, kind: input, shape index: {}]   ;;  %s139_s1 = inlined_call_operand.vmem [shape: f32[8,1], index: 1, kind: input, shape index: {}]   ;;  %s140_s2 = inlined_call_operand.hbm [shape: f32[8,256], index: 2, kind: output, shape index: {}]  }
   0x1   :  { %8 = vsyncpa [#allocation4], 0  ;;  %s14_s11 = sshll.u32 %s138_s0, 4  ;;  %s111_s12 = smov [#allocation2]   ;;  %s15_s11 = int_to_ptr.hbm [resolvable:$true] %s14_s11 }
   0x2   :  { %s16_s13 = sshll.u32 %s111_s12, 4  ;;  %s17_s13 = int_to_ptr.vmem [resolvable:$true] %s16_s13 }
   0x3   :  { %19 = dma.hbm_to_vmem [thread:$0]  %s15_s11, 256, %s17_s13, [#allocation3]  }
   0x4   :  { %107 = dma.done.wait [#allocation3], 256  }
   0x5   :  { %108 = vsyncadd [#allocation3], 4294967040  ;;  %v112_v0 = vmov 0   ;;  %v28_v1 = vld [vmem:[%s139_s1] sm:$0xff]  ;;  %v27_v3 = vld [vmem:[#allocation2 + $0x8] sm:$0xff]  ;;  %s113_s16 = smov [#allocation5]  }
   0x6   :  { %58 = vset.pattern.permute.xlu0 %v112_v0  ;;  %v26_v2 = vld [vmem:[#allocation2] sm:$0xff]  ;;  %s43_s17 = sshll.u32 %s113_s16, 4  ;;  %s45_s19 = sshll.u32 %s140_s2, 4  ;;  %s44_s17 = int_to_ptr.vmem [resolvable:$true] %s43_s17  ;;  %s46_s19 = int_to_ptr.hbm [resolvable:$true] %s45_s19 }
   0x7   :  { %31 = vperm.xlu0 %58, %v28_v1  }
  0x79   :  { %v32_v4 = vpop.permute.xlu0 %31 }
  0x7a   :  { %v34_v5 = vadd.f32 %v32_v4, %v26_v2  ;;  %v35_v6 = vadd.f32 %v32_v4, %v27_v3 }
  0x7c   :  { %36 = vst [vmem:[#allocation5] sm:$0xff] %v34_v5 }
  0x7d   :  { %37 = vst [vmem:[#allocation5 + $0x8] sm:$0xff] %v35_v6 }
  0x7e   :  { %48 = dma.vmem_to_hbm [thread:$0]  %s44_s17, 256, %s46_s19, [#allocation4]  }
  0x7f   :  { %109 = dma.done.wait [#allocation4], 256  }
  0x80   :  { %110 = vsyncadd [#allocation4], 4294967040 }
  0x81   :  { %53 = vsyncpa [#allocation3], 1 }
  0x82   :  { %54 = vsyncpa [#allocation4], 1 }

</bundles_post_ra>
